<compile_context>
chip_gen: v6e
topology: v6e:2x2x1
jax: 0.10.0
libtpu: 0.0.40
codegen_flags: <defaults>
</compile_context>

<pallas_src>
import functools

import jax
import jax.numpy as jnp
import numpy as np
from jax.experimental import pallas as pl
from jax.experimental.pallas import tpu as pltpu

_MIB = 1024 * 1024
_PAD_NEG = -1e30  # mask padding value: fails thresholds and never wins argmax


def _init_kernel(fmap_ref, fg_ref, bg_ref, fg_out_ref, bg_out_ref,
                 fg_acc, fg_cnt, fg_max, fg_fb, bg_acc, bg_cnt,
                 *, fg_thresh: float, bg_thresh: float):
    """One (batch, HW-tile) grid step.

    fmap_ref  : (1, C,  THW)  feature tile (channels on sublanes, HW on lanes)
    fg_ref    : (1, I,  THW)  fg mask tile
    bg_ref    : (1, Qb, THW)  bg mask tile
    fg_out_ref: (1, I,  C)    written only on the last HW tile
    bg_out_ref: (1, Qb, C)    written only on the last HW tile
    scratch   : f32 accumulators persisting across the HW reduction axis.
    """
    k = pl.program_id(1)
    nk = pl.num_programs(1)

    @pl.when(k == 0)
    def _():
        fg_acc[...] = jnp.zeros_like(fg_acc)
        fg_cnt[...] = jnp.zeros_like(fg_cnt)
        fg_max[...] = jnp.full_like(fg_max, -jnp.inf)
        fg_fb[...] = jnp.zeros_like(fg_fb)
        bg_acc[...] = jnp.zeros_like(bg_acc)
        bg_cnt[...] = jnp.zeros_like(bg_cnt)

    fmap_t = fmap_ref[0]                               # [C, THW], native dtype
    fg = fg_ref[0].astype(jnp.float32)                 # [I, THW]
    bg = bg_ref[0].astype(jnp.float32)                 # [Qb, THW]
    thw = fg.shape[-1]

    # Exact f32 contraction when fmap is f32 (kernel is HBM-bound, so the
    # extra MXU passes are free wall-clock).
    prec = (jax.lax.Precision.HIGHEST if fmap_t.dtype == jnp.float32
            else jax.lax.Precision.DEFAULT)
    dn = (((1,), (1,)), ((), ()))                      # contract last vs last

    fg_bin = (fg > fg_thresh).astype(jnp.float32)      # [I, THW]
    bg_bin = (bg > bg_thresh).astype(jnp.float32)      # [Qb, THW]

    # Masked feature sums for this tile (MXU, f32 accumulation).
    fg_acc[...] += jax.lax.dot_general(
        fg_bin.astype(fmap_t.dtype), fmap_t, dimension_numbers=dn,
        precision=prec, preferred_element_type=jnp.float32)          # [I, C]
    bg_acc[...] += jax.lax.dot_general(
        bg_bin.astype(fmap_t.dtype), fmap_t, dimension_numbers=dn,
        precision=prec, preferred_element_type=jnp.float32)          # [Qb, C]

    fg_cnt[...] += jnp.sum(fg_bin, axis=-1, keepdims=True)           # [I, 1]
    bg_cnt[...] += jnp.sum(bg_bin, axis=-1, keepdims=True)           # [Qb, 1]

    # Incremental argmax fallback — foreground rows only (bg fallback = 0):
    #  - first occurrence within the tile via min over matching indices,
    #  - strict ">" across tiles keeps the earliest tile on ties,
    #    matching torch.argmax's first-occurrence behaviour.
    tile_max = jnp.max(fg, axis=-1, keepdims=True)                   # [I, 1]
    iota = jax.lax.broadcasted_iota(jnp.int32, fg.shape, 1)          # [I, THW]
    first_idx = jnp.min(jnp.where(fg == tile_max, iota, thw),
                        axis=-1, keepdims=True)                      # [I, 1]
    one_hot = (iota == first_idx).astype(fmap_t.dtype)               # [I, THW]
    cand = jax.lax.dot_general(
        one_hot, fmap_t, dimension_numbers=dn,
        precision=prec, preferred_element_type=jnp.float32)          # [I, C]
    improved = tile_max > fg_max[...]                                # [I, 1]
    fg_fb[...] = jnp.where(improved, cand, fg_fb[...])
    fg_max[...] = jnp.maximum(fg_max[...], tile_max)

    @pl.when(k == nk - 1)
    def _():
        fcnt = fg_cnt[...]
        favg = fg_acc[...] / jnp.maximum(fcnt, 1.0)
        fg_out_ref[0] = jnp.where(fcnt > 0.0, favg,
                                  fg_fb[...]).astype(fg_out_ref.dtype)
        bcnt = bg_cnt[...]
        bavg = bg_acc[...] / jnp.maximum(bcnt, 1.0)
        bg_out_ref[0] = jnp.where(bcnt > 0.0, bavg,
                                  0.0).astype(bg_out_ref.dtype)


def _round_up(x: int, m: int) -> int:
    return -(-x // m) * m


def _tile_working_set_bytes(t: int, c: int, i: int, qb: int,
                            fmap_itemsize: int, mask_itemsize: int) -> int:
    """Approximate VMEM bytes for one HW tile, counting double-buffering of all
    pipelined operands plus outputs and f32 scratch (with (8,128) padding)."""
    lanes = _round_up(t, 128)
    c_lanes = _round_up(c, 128)
    fmap_b = 2 * _round_up(c, 8) * lanes * fmap_itemsize
    mask_b = 2 * (_round_up(i, 8) + _round_up(qb, 8)) * lanes * mask_itemsize
    out_b = 2 * (_round_up(i, 8) + _round_up(qb, 8)) * c_lanes * fmap_itemsize
    scratch_b = (_round_up(i, 8) * (2 * c_lanes + 2 * 128)
                 + _round_up(qb, 8) * (c_lanes + 128)) * 4
    return fmap_b + mask_b + out_b + scratch_b + 2 * _MIB  # + compiler scratch


def _plan_tiles(hw: int, c: int, i: int, qb: int,
                fmap_itemsize: int, mask_itemsize: int,
                tile_hw: int | None = None):
    """Pick a lane-aligned HW tile whose full working set fits a per-generation
    VMEM budget, the padded HW extent, and an explicit scoped-VMEM limit."""
    try:
        capacity = int(pltpu.get_tpu_info().vmem_capacity_bytes)
    except Exception:
        capacity = 64 * _MIB  # conservative fallback (v7x per-core VMEM)
    budget = min(int(0.70 * capacity), 96 * _MIB)

    if tile_hw is None:
        hw_ceil = _round_up(hw, 128)
        tile_hw = 128
        for cand in (2048, 1024, 512, 256, 128):
            if cand <= hw_ceil and _tile_working_set_bytes(
                    cand, c, i, qb, fmap_itemsize, mask_itemsize) <= budget:
                tile_hw = cand
                break
    assert tile_hw % 128 == 0, "tile_hw must be lane-aligned (multiple of 128)"

    hw_pad = _round_up(hw, tile_hw)
    return tile_hw, hw_pad, budget


def avg_pooling_initializer(fmap_nchw, fg_mask_nchw, bg_mask_nchw,
                            fg_thresh: float = 0.5, bg_thresh: float = 0.5,
                            tile_hw: int | None = None):
    """fmap [B,C,H,W], fg_mask [B,I,H,W], bg_mask [B,Qb,H,W] -> ([B,I,C], [B,Qb,C])."""
    B, C, H, W = fmap_nchw.shape
    I = fg_mask_nchw.shape[1]
    Qb = bg_mask_nchw.shape[1]
    HW = H * W

    # Free reshapes only: fmap stays channel-major (no NHWC transpose in HBM);
    # fg/bg masks stay separate operands (no concat materialization in HBM).
    fmap = fmap_nchw.reshape(B, C, HW)                 # [B, C, HW]
    fg = fg_mask_nchw.reshape(B, I, HW)                # [B, I, HW]
    bg = bg_mask_nchw.reshape(B, Qb, HW)               # [B, Qb, HW]

    tile_hw, hw_pad, vmem_limit = _plan_tiles(
        HW, C, I, Qb,
        jnp.dtype(fmap.dtype).itemsize, jnp.dtype(fg.dtype).itemsize, tile_hw)

    if hw_pad != HW:
        # Pad HW so every tile is lane-aligned: fmap with zeros (never selected),
        # masks with a huge negative so padded positions fail both thresholds
        # and can never win the argmax fallback.
        pad = hw_pad - HW
        fmap = jnp.pad(fmap, ((0, 0), (0, 0), (0, pad)))
        fg = jnp.pad(fg, ((0, 0), (0, 0), (0, pad)), constant_values=_PAD_NEG)
        bg = jnp.pad(bg, ((0, 0), (0, 0), (0, pad)), constant_values=_PAD_NEG)

    num_tiles = hw_pad // tile_hw
    kernel = functools.partial(_init_kernel,
                               fg_thresh=float(fg_thresh),
                               bg_thresh=float(bg_thresh))

    # TODO(synk): for B == 1 on v7x, split the HW reduction across the two
    # TensorCores (per-core partial acc/cnt/max/fb + tiny combine) so both
    # cores and their DMA issue capacity are used.
    fg_out, bg_out = pl.pallas_call(
        kernel,
        out_shape=(jax.ShapeDtypeStruct((B, I, C), fmap.dtype),
                   jax.ShapeDtypeStruct((B, Qb, C), fmap.dtype)),
        grid_spec=pltpu.PrefetchScalarGridSpec(
            num_scalar_prefetch=0,
            grid=(B, num_tiles),                 # HW tiles = reduction axis (last)
            in_specs=[
                pl.BlockSpec((1, C, tile_hw), lambda b, k: (b, 0, k)),   # fmap
                pl.BlockSpec((1, I, tile_hw), lambda b, k: (b, 0, k)),   # fg mask
                pl.BlockSpec((1, Qb, tile_hw), lambda b, k: (b, 0, k)),  # bg mask
            ],
            out_specs=(
                pl.BlockSpec((1, I, C), lambda b, k: (b, 0, 0)),
                pl.BlockSpec((1, Qb, C), lambda b, k: (b, 0, 0)),
            ),
            scratch_shapes=[
                pltpu.VMEM((I, C), jnp.float32),    # fg masked feature sum
                pltpu.VMEM((I, 1), jnp.float32),    # fg selected count
                pltpu.VMEM((I, 1), jnp.float32),    # fg running max (fallback)
                pltpu.VMEM((I, C), jnp.float32),    # fg fallback feature
                pltpu.VMEM((Qb, C), jnp.float32),   # bg masked feature sum
                pltpu.VMEM((Qb, 1), jnp.float32),   # bg selected count
            ],
        ),
        compiler_params=pltpu.CompilerParams(
            dimension_semantics=("parallel", "arbitrary"),
            vmem_limit_bytes=int(vmem_limit)),
    )(fmap, fg, bg)

    return fg_out, bg_out


def _reference(fmap_nchw, fg_mask, bg_mask, fg_thresh=0.5, bg_thresh=0.5):
    """Pure NumPy re-implementation of the PyTorch forward (for verification)."""
    fmap_nchw = np.asarray(fmap_nchw)
    fg_mask = np.asarray(fg_mask)
    bg_mask = np.asarray(bg_mask)
    B, C, H, W = fmap_nchw.shape
    fmap = np.transpose(fmap_nchw, (0, 2, 3, 1)).reshape(B, H * W, C)
    fg = fg_mask.reshape(B, fg_mask.shape[1], H * W)
    bg = bg_mask.reshape(B, bg_mask.shape[1], H * W)
    fg_init = np.zeros((B, fg.shape[1], C), np.float32)
    bg_init = np.zeros((B, bg.shape[1], C), np.float32)
    for b in range(B):
        for i in range(fg.shape[1]):
            coords = np.nonzero(fg[b, i] > fg_thresh)[0]
            if coords.size == 0:
                coords = np.array([np.argmax(fg[b, i])])
            fg_init[b, i] = fmap[b, coords].mean(0)
        for q in range(bg.shape[1]):
            coords = np.nonzero(bg[b, q] > bg_thresh)[0]
            if coords.size == 0:
                bg_init[b, q] = 0.0
            else:
                bg_init[b, q] = fmap[b, coords].mean(0)
    return fg_init, bg_init


if __name__ == "__main__":
    # num_bg_queries = 4 -> grid_dims (2, 2)
    B, C, H, W = 2, 32, 16, 16
    I, Qb = 3, 4

    key = jax.random.PRNGKey(0)
    k1, k2, k3 = jax.random.split(key, 3)
    fmap = jax.random.normal(k1, (B, C, H, W), dtype=jnp.float32)
    fg_mask = jax.random.uniform(k2, (B, I, H, W), dtype=jnp.float32)
    bg_mask = jax.random.uniform(k3, (B, Qb, H, W), dtype=jnp.float32)
    # Exercise the fallback branches: one fg query with nothing above thresh
    # (argmax-feature fallback), one bg query entirely below thresh (zeros).
    fg_mask = fg_mask.at[0, 0].set(fg_mask[0, 0] * 0.4)
    bg_mask = bg_mask.at[1, 2].set(0.0)

    fg_ref, bg_ref = _reference(fmap, fg_mask, bg_mask)

    # 1) Multi-tile reduction path: force 2 HW tiles of 128 to exercise the
    #    accumulator / running-argmax-across-tiles logic.
    fn_tiled = jax.jit(functools.partial(avg_pooling_initializer, tile_hw=128))
    fg_out, bg_out = fn_tiled(fmap, fg_mask, bg_mask)
    jax.block_until_ready((fg_out, bg_out))
    np.testing.assert_allclose(np.asarray(fg_out), fg_ref, rtol=1e-5, atol=1e-5)
    np.testing.assert_allclose(np.asarray(bg_out), bg_ref, rtol=1e-5, atol=1e-5)

    # 2) Auto-planned tile (single 256-lane tile at this toy HW).
    fg_out2, bg_out2 = jax.jit(avg_pooling_initializer)(fmap, fg_mask, bg_mask)
    jax.block_until_ready((fg_out2, bg_out2))
    np.testing.assert_allclose(np.asarray(fg_out2), fg_ref, rtol=1e-5, atol=1e-5)
    np.testing.assert_allclose(np.asarray(bg_out2), bg_ref, rtol=1e-5, atol=1e-5)

    # 3) Ragged HW (9*16 = 144 -> padded to 256, second 128-lane tile is mostly
    #    padding) to exercise the pad + cross-tile argmax path.
    H2, W2 = 9, 16
    fmap_r = jax.random.normal(k1, (B, C, H2, W2), dtype=jnp.float32)
    fg_r = jax.random.uniform(k2, (B, I, H2, W2), dtype=jnp.float32)
    bg_r = jax.random.uniform(k3, (B, Qb, H2, W2), dtype=jnp.float32)
    fg_r = fg_r.at[0, 0].set(fg_r[0, 0] * 0.4)
    bg_r = bg_r.at[1, 2].set(0.0)
    fg_ref_r, bg_ref_r = _reference(fmap_r, fg_r, bg_r)
    fg_out_r, bg_out_r = fn_tiled(fmap_r, fg_r, bg_r)
    jax.block_until_ready((fg_out_r, bg_out_r))
    np.testing.assert_allclose(np.asarray(fg_out_r), fg_ref_r, rtol=1e-5, atol=1e-5)
    np.testing.assert_allclose(np.asarray(bg_out_r), bg_ref_r, rtol=1e-5, atol=1e-5)

    assert fg_out.shape == (B, I, C) and bg_out.shape == (B, Qb, C)
    print("KERNEL_OK")
</pallas_src>

<mosaic_0001>
module attributes {stable_mosaic.version = 11 : i64} {
  func.func @_init_kernel(%arg0: i32, %arg1: i32, %arg2: memref<1x32x128xf32, #tpu.memory_space<vmem>>, %arg3: memref<1x3x128xf32, #tpu.memory_space<vmem>>, %arg4: memref<1x4x128xf32, #tpu.memory_space<vmem>>, %arg5: memref<1x3x32xf32, #tpu.memory_space<vmem>>, %arg6: memref<1x4x32xf32, #tpu.memory_space<vmem>>, %arg7: memref<3x32xf32, #tpu.memory_space<vmem>>, %arg8: memref<3x1xf32, #tpu.memory_space<vmem>>, %arg9: memref<3x1xf32, #tpu.memory_space<vmem>>, %arg10: memref<3x32xf32, #tpu.memory_space<vmem>>, %arg11: memref<4x32xf32, #tpu.memory_space<vmem>>, %arg12: memref<4x1xf32, #tpu.memory_space<vmem>>) attributes {dimension_semantics = [#tpu.dimension_semantics<parallel>, #tpu.dimension_semantics<arbitrary>], iteration_bounds = array<i64: 2, 2>, scalar_prefetch = 0 : i64, scratch_operands = 6 : i64, tpu.core_type = #tpu.core_type<tc>, window_params = [{transform_indices = @transform_0, window_bounds = array<i64: 1, 32, 128>}, {transform_indices = @transform_1, window_bounds = array<i64: 1, 3, 128>}, {transform_indices = @transform_2, window_bounds = array<i64: 1, 4, 128>}, {transform_indices = @transform_3, window_bounds = array<i64: 1, 3, 32>}, {transform_indices = @transform_4, window_bounds = array<i64: 1, 4, 32>}]} {
    %c0_i32 = arith.constant 0 : i32
    %0 = arith.cmpi eq, %arg1, %c0_i32 : i32
    %1 = arith.extui %0 : i1 to i32
    %c0_i32_0 = arith.constant 0 : i32
    %2 = arith.cmpi ne, %1, %c0_i32_0 : i32
    scf.if %2 {
      %cst_44 = arith.constant 0.000000e+00 : f32
      %62 = vector.broadcast %cst_44 : f32 to vector<3x32xf32>
      %c0_45 = arith.constant 0 : index
      %c0_46 = arith.constant 0 : index
      %63 = vector.load %arg7[%c0_45, %c0_46] : memref<3x32xf32, #tpu.memory_space<vmem>>, vector<3x32xf32>
      tpu.vector_store %arg7[%c0_45, %c0_46], %62 {strides = array<i32>} : memref<3x32xf32, #tpu.memory_space<vmem>>, vector<3x32xf32>,
      %cst_47 = arith.constant 0.000000e+00 : f32
      %64 = vector.broadcast %cst_47 : f32 to vector<3x1xf32>
      %c0_48 = arith.constant 0 : index
      %c0_49 = arith.constant 0 : index
      %65 = vector.load %arg8[%c0_48, %c0_49] : memref<3x1xf32, #tpu.memory_space<vmem>>, vector<3x1xf32>
      tpu.vector_store %arg8[%c0_48, %c0_49], %64 {strides = array<i32>} : memref<3x1xf32, #tpu.memory_space<vmem>>, vector<3x1xf32>,
      %cst_50 = arith.constant 0xFF800000 : f32
      %66 = vector.broadcast %cst_50 : f32 to vector<3x1xf32>
      %c0_51 = arith.constant 0 : index
      %c0_52 = arith.constant 0 : index
      %67 = vector.load %arg9[%c0_51, %c0_52] : memref<3x1xf32, #tpu.memory_space<vmem>>, vector<3x1xf32>
      tpu.vector_store %arg9[%c0_51, %c0_52], %66 {strides = array<i32>} : memref<3x1xf32, #tpu.memory_space<vmem>>, vector<3x1xf32>,
      %cst_53 = arith.constant 0.000000e+00 : f32
      %68 = vector.broadcast %cst_53 : f32 to vector<3x32xf32>
      %c0_54 = arith.constant 0 : index
      %c0_55 = arith.constant 0 : index
      %69 = vector.load %arg10[%c0_54, %c0_55] : memref<3x32xf32, #tpu.memory_space<vmem>>, vector<3x32xf32>
      tpu.vector_store %arg10[%c0_54, %c0_55], %68 {strides = array<i32>} : memref<3x32xf32, #tpu.memory_space<vmem>>, vector<3x32xf32>,
      %cst_56 = arith.constant 0.000000e+00 : f32
      %70 = vector.broadcast %cst_56 : f32 to vector<4x32xf32>
      %c0_57 = arith.constant 0 : index
      %c0_58 = arith.constant 0 : index
      %71 = vector.load %arg11[%c0_57, %c0_58] : memref<4x32xf32, #tpu.memory_space<vmem>>, vector<4x32xf32>
      tpu.vector_store %arg11[%c0_57, %c0_58], %70 {strides = array<i32>} : memref<4x32xf32, #tpu.memory_space<vmem>>, vector<4x32xf32>,
      %cst_59 = arith.constant 0.000000e+00 : f32
      %72 = vector.broadcast %cst_59 : f32 to vector<4x1xf32>
      %c0_60 = arith.constant 0 : index
      %c0_61 = arith.constant 0 : index
      %73 = vector.load %arg12[%c0_60, %c0_61] : memref<4x1xf32, #tpu.memory_space<vmem>>, vector<4x1xf32>
      tpu.vector_store %arg12[%c0_60, %c0_61], %72 {strides = array<i32>} : memref<4x1xf32, #tpu.memory_space<vmem>>, vector<4x1xf32>,
    } else {
    }
    %c0 = arith.constant 0 : index
    %c0_1 = arith.constant 0 : index
    %c0_2 = arith.constant 0 : index
    %3 = vector.load %arg2[%c0, %c0_1, %c0_2] : memref<1x32x128xf32, #tpu.memory_space<vmem>>, vector<1x32x128xf32>
    %4 = vector.shape_cast %3 : vector<1x32x128xf32> to vector<32x128xf32>
    %c0_3 = arith.constant 0 : index
    %c0_4 = arith.constant 0 : index
    %c0_5 = arith.constant 0 : index
    %5 = vector.load %arg3[%c0_3, %c0_4, %c0_5] : memref<1x3x128xf32, #tpu.memory_space<vmem>>, vector<1x3x128xf32>
    %6 = vector.shape_cast %5 : vector<1x3x128xf32> to vector<3x128xf32>
    %c0_6 = arith.constant 0 : index
    %c0_7 = arith.constant 0 : index
    %c0_8 = arith.constant 0 : index
    %7 = vector.load %arg4[%c0_6, %c0_7, %c0_8] : memref<1x4x128xf32, #tpu.memory_space<vmem>>, vector<1x4x128xf32>
    %8 = vector.shape_cast %7 : vector<1x4x128xf32> to vector<4x128xf32>
    %cst = arith.constant 5.000000e-01 : f32
    %9 = vector.broadcast %cst : f32 to vector<3x128xf32>
    %10 = arith.cmpf ogt, %6, %9 : vector<3x128xf32>
    %11 = arith.extui %10 : vector<3x128xi1> to vector<3x128xi32>
    %12 = arith.sitofp %11 : vector<3x128xi32> to vector<3x128xf32>
    %cst_9 = arith.constant 5.000000e-01 : f32
    %13 = vector.broadcast %cst_9 : f32 to vector<4x128xf32>
    %14 = arith.cmpf ogt, %8, %13 : vector<4x128xf32>
    %15 = arith.extui %14 : vector<4x128xi1> to vector<4x128xi32>
    %16 = arith.sitofp %15 : vector<4x128xi32> to vector<4x128xf32>
    %c0_10 = arith.constant 0 : index
    %c0_11 = arith.constant 0 : index
    %17 = vector.load %arg7[%c0_10, %c0_11] : memref<3x32xf32, #tpu.memory_space<vmem>>, vector<3x32xf32>
    %cst_12 = arith.constant dense<0.000000e+00> : vector<3x32xf32>
    %18 = tpu.matmul %12, %4, %cst_12 {dimension_numbers = #tpu.dot_dimension_numbers<[1], [1], [0], [0], [0, 0, 1, 0], [], []>, precision = #tpu.contract_precision<fp32>} : vector<3x128xf32>, vector<32x128xf32>, vector<3x32xf32> -> vector<3x32xf32>
    %19 = arith.addf %17, %18 : vector<3x32xf32>
    %c0_13 = arith.constant 0 : index
    %c0_14 = arith.constant 0 : index
    %20 = vector.load %arg7[%c0_13, %c0_14] : memref<3x32xf32, #tpu.memory_space<vmem>>, vector<3x32xf32>
    tpu.vector_store %arg7[%c0_13, %c0_14], %19 {strides = array<i32>} : memref<3x32xf32, #tpu.memory_space<vmem>>, vector<3x32xf32>,
    %c0_15 = arith.constant 0 : index
    %c0_16 = arith.constant 0 : index
    %21 = vector.load %arg11[%c0_15, %c0_16] : memref<4x32xf32, #tpu.memory_space<vmem>>, vector<4x32xf32>
    %cst_17 = arith.constant dense<0.000000e+00> : vector<4x32xf32>
    %22 = tpu.matmul %16, %4, %cst_17 {dimension_numbers = #tpu.dot_dimension_numbers<[1], [1], [0], [0], [0, 0, 1, 0], [], []>, precision = #tpu.contract_precision<fp32>} : vector<4x128xf32>, vector<32x128xf32>, vector<4x32xf32> -> vector<4x32xf32>
    %23 = arith.addf %21, %22 : vector<4x32xf32>
    %c0_18 = arith.constant 0 : index
    %c0_19 = arith.constant 0 : index
    %24 = vector.load %arg11[%c0_18, %c0_19] : memref<4x32xf32, #tpu.memory_space<vmem>>, vector<4x32xf32>
    tpu.vector_store %arg11[%c0_18, %c0_19], %23 {strides = array<i32>} : memref<4x32xf32, #tpu.memory_space<vmem>>, vector<4x32xf32>,
    %c0_20 = arith.constant 0 : index
    %c0_21 = arith.constant 0 : index
    %25 = vector.load %arg8[%c0_20, %c0_21] : memref<3x1xf32, #tpu.memory_space<vmem>>, vector<3x1xf32>
    %cst_22 = arith.constant dense<0.000000e+00> : vector<3xf32>
    %26 = vector.multi_reduction <add>, %12, %cst_22 [1] : vector<3x128xf32> to vector<3xf32>
    %27 = vector.shape_cast %26 : vector<3xf32> to vector<3x1xf32>
    %28 = arith.addf %25, %27 : vector<3x1xf32>
    %c0_23 = arith.constant 0 : index
    %c0_24 = arith.constant 0 : index
    %29 = vector.load %arg8[%c0_23, %c0_24] : memref<3x1xf32, #tpu.memory_space<vmem>>, vector<3x1xf32>
    tpu.vector_store %arg8[%c0_23, %c0_24], %28 {strides = array<i32>} : memref<3x1xf32, #tpu.memory_space<vmem>>, vector<3x1xf32>,
    %c0_25 = arith.constant 0 : index
    %c0_26 = arith.constant 0 : index
    %30 = vector.load %arg12[%c0_25, %c0_26] : memref<4x1xf32, #tpu.memory_space<vmem>>, vector<4x1xf32>
    %cst_27 = arith.constant dense<0.000000e+00> : vector<4xf32>
    %31 = vector.multi_reduction <add>, %16, %cst_27 [1] : vector<4x128xf32> to vector<4xf32>
    %32 = vector.shape_cast %31 : vector<4xf32> to vector<4x1xf32>
    %33 = arith.addf %30, %32 : vector<4x1xf32>
    %c0_28 = arith.constant 0 : index
    %c0_29 = arith.constant 0 : index
    %34 = vector.load %arg12[%c0_28, %c0_29] : memref<4x1xf32, #tpu.memory_space<vmem>>, vector<4x1xf32>
    tpu.vector_store %arg12[%c0_28, %c0_29], %33 {strides = array<i32>} : memref<4x1xf32, #tpu.memory_space<vmem>>, vector<4x1xf32>,
    %cst_30 = arith.constant dense<0xFF800000> : vector<3xf32>
    %35 = vector.multi_reduction <maximumf>, %6, %cst_30 [1] : vector<3x128xf32> to vector<3xf32>
    %36 = vector.shape_cast %35 : vector<3xf32> to vector<3x1xf32>
    %37 = tpu.iota {dimensions = array<i32: 1>} : vector<3x128xi32>
    %38 = vector.broadcast %36 : vector<3x1xf32> to vector<3x128xf32>
    %39 = arith.cmpf oeq, %6, %38 : vector<3x128xf32>
    %c128_i32 = arith.constant 128 : i32
    %40 = vector.broadcast %c128_i32 : i32 to vector<3x128xi32>
    %41 = arith.select %39, %37, %40 : vector<3x128xi1>, vector<3x128xi32>
    %cst_31 = arith.constant dense<2147483647> : vector<3xi32>
    %42 = vector.multi_reduction <minsi>, %41, %cst_31 [1] : vector<3x128xi32> to vector<3xi32>
    %43 = vector.shape_cast %42 : vector<3xi32> to vector<3x1xi32>
    %44 = vector.broadcast %43 : vector<3x1xi32> to vector<3x128xi32>
    %45 = arith.cmpi eq, %37, %44 : vector<3x128xi32>
    %46 = arith.extui %45 : vector<3x128xi1> to vector<3x128xi32>
    %47 = arith.sitofp %46 : vector<3x128xi32> to vector<3x128xf32>
    %cst_32 = arith.constant dense<0.000000e+00> : vector<3x32xf32>
    %48 = tpu.matmul %47, %4, %cst_32 {dimension_numbers = #tpu.dot_dimension_numbers<[1], [1], [0], [0], [0, 0, 1, 0], [], []>, precision = #tpu.contract_precision<fp32>} : vector<3x128xf32>, vector<32x128xf32>, vector<3x32xf32> -> vector<3x32xf32>
    %c0_33 = arith.constant 0 : index
    %c0_34 = arith.constant 0 : index
    %49 = vector.load %arg9[%c0_33, %c0_34] : memref<3x1xf32, #tpu.memory_space<vmem>>, vector<3x1xf32>
    %50 = arith.cmpf ogt, %36, %49 : vector<3x1xf32>
    %c0_35 = arith.constant 0 : index
    %c0_36 = arith.constant 0 : index
    %51 = vector.load %arg10[%c0_35, %c0_36] : memref<3x32xf32, #tpu.memory_space<vmem>>, vector<3x32xf32>
    %52 = vector.shape_cast %50 : vector<3x1xi1> to vector<3x1xi1>
    %53 = vector.broadcast %52 : vector<3x1xi1> to vector<3x32xi1>
    %54 = arith.select %53, %48, %51 : vector<3x32xi1>, vector<3x32xf32>
    %c0_37 = arith.constant 0 : index
    %c0_38 = arith.constant 0 : index
    %55 = vector.load %arg10[%c0_37, %c0_38] : memref<3x32xf32, #tpu.memory_space<vmem>>, vector<3x32xf32>
    tpu.vector_store %arg10[%c0_37, %c0_38], %54 {strides = array<i32>} : memref<3x32xf32, #tpu.memory_space<vmem>>, vector<3x32xf32>,
    %c0_39 = arith.constant 0 : index
    %c0_40 = arith.constant 0 : index
    %56 = vector.load %arg9[%c0_39, %c0_40] : memref<3x1xf32, #tpu.memory_space<vmem>>, vector<3x1xf32>
    %57 = arith.maximumf %56, %36 : vector<3x1xf32>
    %c0_41 = arith.constant 0 : index
    %c0_42 = arith.constant 0 : index
    %58 = vector.load %arg9[%c0_41, %c0_42] : memref<3x1xf32, #tpu.memory_space<vmem>>, vector<3x1xf32>
    tpu.vector_store %arg9[%c0_41, %c0_42], %57 {strides = array<i32>} : memref<3x1xf32, #tpu.memory_space<vmem>>, vector<3x1xf32>,
    %c1_i32 = arith.constant 1 : i32
    %59 = arith.cmpi eq, %arg1, %c1_i32 : i32
    %60 = arith.extui %59 : i1 to i32
    %c0_i32_43 = arith.constant 0 : i32
    %61 = arith.cmpi ne, %60, %c0_i32_43 : i32
    scf.if %61 {
      %c0_44 = arith.constant 0 : index
      %c0_45 = arith.constant 0 : index
      %62 = vector.load %arg8[%c0_44, %c0_45] : memref<3x1xf32, #tpu.memory_space<vmem>>, vector<3x1xf32>
      %c0_46 = arith.constant 0 : index
      %c0_47 = arith.constant 0 : index
      %63 = vector.load %arg7[%c0_46, %c0_47] : memref<3x32xf32, #tpu.memory_space<vmem>>, vector<3x32xf32>
      %cst_48 = arith.constant 1.000000e+00 : f32
      %64 = vector.broadcast %cst_48 : f32 to vector<3x1xf32>
      %65 = arith.maximumf %62, %64 : vector<3x1xf32>
      %66 = vector.broadcast %65 : vector<3x1xf32> to vector<3x32xf32>
      %67 = arith.divf %63, %66 : vector<3x32xf32>
      %cst_49 = arith.constant 0.000000e+00 : f32
      %68 = vector.broadcast %cst_49 : f32 to vector<3x1xf32>
      %69 = arith.cmpf ogt, %62, %68 : vector<3x1xf32>
      %c0_50 = arith.constant 0 : index
      %c0_51 = arith.constant 0 : index
      %70 = vector.load %arg10[%c0_50, %c0_51] : memref<3x32xf32, #tpu.memory_space<vmem>>, vector<3x32xf32>
      %71 = vector.shape_cast %69 : vector<3x1xi1> to vector<3x1xi1>
      %72 = vector.broadcast %71 : vector<3x1xi1> to vector<3x32xi1>
      %73 = arith.select %72, %67, %70 : vector<3x32xi1>, vector<3x32xf32>
      %c0_52 = arith.constant 0 : index
      %c0_53 = arith.constant 0 : index
      %c0_54 = arith.constant 0 : index
      %74 = vector.load %arg5[%c0_52, %c0_53, %c0_54] : memref<1x3x32xf32, #tpu.memory_space<vmem>>, vector<1x3x32xf32>
      %75 = vector.shape_cast %74 : vector<1x3x32xf32> to vector<3x32xf32>
      %76 = vector.shape_cast %73 : vector<3x32xf32> to vector<1x3x32xf32>
      tpu.vector_store %arg5[%c0_52, %c0_53, %c0_54], %76 {strides = array<i32>} : memref<1x3x32xf32, #tpu.memory_space<vmem>>, vector<1x3x32xf32>,
      %c0_55 = arith.constant 0 : index
      %c0_56 = arith.constant 0 : index
      %77 = vector.load %arg12[%c0_55, %c0_56] : memref<4x1xf32, #tpu.memory_space<vmem>>, vector<4x1xf32>
      %c0_57 = arith.constant 0 : index
      %c0_58 = arith.constant 0 : index
      %78 = vector.load %arg11[%c0_57, %c0_58] : memref<4x32xf32, #tpu.memory_space<vmem>>, vector<4x32xf32>
      %cst_59 = arith.constant 1.000000e+00 : f32
      %79 = vector.broadcast %cst_59 : f32 to vector<4x1xf32>
      %80 = arith.maximumf %77, %79 : vector<4x1xf32>
      %81 = vector.broadcast %80 : vector<4x1xf32> to vector<4x32xf32>
      %82 = arith.divf %78, %81 : vector<4x32xf32>
      %cst_60 = arith.constant 0.000000e+00 : f32
      %83 = vector.broadcast %cst_60 : f32 to vector<4x1xf32>
      %84 = arith.cmpf ogt, %77, %83 : vector<4x1xf32>
      %cst_61 = arith.constant 0.000000e+00 : f32
      %85 = vector.shape_cast %84 : vector<4x1xi1> to vector<4x1xi1>
      %86 = vector.broadcast %85 : vector<4x1xi1> to vector<4x32xi1>
      %87 = vector.broadcast %cst_61 : f32 to vector<4x32xf32>
      %88 = arith.select %86, %82, %87 : vector<4x32xi1>, vector<4x32xf32>
      %c0_62 = arith.constant 0 : index
      %c0_63 = arith.constant 0 : index
      %c0_64 = arith.constant 0 : index
      %89 = vector.load %arg6[%c0_62, %c0_63, %c0_64] : memref<1x4x32xf32, #tpu.memory_space<vmem>>, vector<1x4x32xf32>
      %90 = vector.shape_cast %89 : vector<1x4x32xf32> to vector<4x32xf32>
      %91 = vector.shape_cast %88 : vector<4x32xf32> to vector<1x4x32xf32>
      tpu.vector_store %arg6[%c0_62, %c0_63, %c0_64], %91 {strides = array<i32>} : memref<1x4x32xf32, #tpu.memory_space<vmem>>, vector<1x4x32xf32>,
    } else {
    }
    return
  }
  func.func @transform_0(%arg0: i32, %arg1: i32) -> (i32, i32, i32) {
    %c0_i32 = arith.constant 0 : i32
    %c0_i32_0 = arith.constant 0 : i32
    return %arg0, %c0_i32, %arg1 : i32, i32, i32
  }
  func.func @transform_1(%arg0: i32, %arg1: i32) -> (i32, i32, i32) {
    %c0_i32 = arith.constant 0 : i32
    %c0_i32_0 = arith.constant 0 : i32
    return %arg0, %c0_i32, %arg1 : i32, i32, i32
  }
  func.func @transform_2(%arg0: i32, %arg1: i32) -> (i32, i32, i32) {
    %c0_i32 = arith.constant 0 : i32
    %c0_i32_0 = arith.constant 0 : i32
    return %arg0, %c0_i32, %arg1 : i32, i32, i32
  }
  func.func @transform_3(%arg0: i32, %arg1: i32) -> (i32, i32, i32) {
    %c0_i32 = arith.constant 0 : i32
    %c0_i32_0 = arith.constant 0 : i32
    %c0_i32_1 = arith.constant 0 : i32
    return %arg0, %c0_i32, %c0_i32_0 : i32, i32, i32
  }
  func.func @transform_4(%arg0: i32, %arg1: i32) -> (i32, i32, i32) {
    %c0_i32 = arith.constant 0 : i32
    %c0_i32_0 = arith.constant 0 : i32
    %c0_i32_1 = arith.constant 0 : i32
    return %arg0, %c0_i32, %c0_i32_0 : i32, i32, i32
  }
}

</mosaic_0001>

<bundles_post_ra>
// kernel: avg_pooling_initializer.1
= control target key start
LH: loop header
LB: loop body
LE: loop exit
PB: predicated region body
PF: predicated region fallthrough
CT: control target
= control target key end

     0   :  { %s3154_s0 = inlined_call_operand.vmem [shape: f32[2,32,256], index: 0, kind: input, shape index: {}]   ;;  %s3155_s1 = inlined_call_operand.vmem [shape: f32[2,3,256], index: 1, kind: input, shape index: {}]   ;;  %s3156_s2 = inlined_call_operand.vmem [shape: f32[2,4,256], index: 2, kind: input, shape index: {}]   ;;  %s3157_s3 = inlined_call_operand.vmem [shape: f32[2,3,32], index: 3, kind: output, shape index: {0}]   ;;  %s3158_s4 = inlined_call_operand.hbm [shape: f32[2,4,32], index: 4, kind: output, shape index: {1}]  }
   0x1   :  { %3165 = sst [smem:[#allocation19_spill]] %s3154_s0 }
   0x2   :  { %10 = vsyncpa [#allocation10], 0 }
   0x3   :  { %12 = vsyncpa [#allocation10 + $0x1], 0  ;;  %s2641_s15 = smov 0   ;;  %s2643_s16 = smov 0  }
   0x4   :  { %s2645_s17 = smov 0   ;;  %s2647_s18 = smov 0  }
   0x5   :  { %s2649_s19 = smov 0   ;;  %s2651_s20 = smov 0  }
   0x6   :  { %s2653_s21 = smov 0   ;;  %s2655_s22 = smov 0  }
   0x7   :  { %s2657_s23 = smov 0   ;;  %s2659_s24 = smov 0  }
   0x8 LB: > { %3166 = sst [smem:[#allocation12_spill]] %s2586_s19  ;;  %s2075_s25 = sadd.s32 4294967295, %s2606_s24   ;;  %s2606_s24 = sphi %s2659_s24, %s18_s24   ;;  %s2602_s23 = sphi %s2657_s23, %s3184_s23   ;;  %s2598_s22 = sphi %s2655_s22, %s3183_s22   ;;  %s2594_s21 = sphi %s2653_s21, %s3182_s21   ;;  %s2590_s20 = sphi %s2651_s20, %s3181_s20   ;;  %s2586_s19 = sphi %s2649_s19, %s3180_s19   ;;  %s2582_s18 = sphi %s2647_s18, %s3188_s18   ;;  %s2578_s17 = sphi %s2645_s17, %s3187_s17   ;;  %s2574_s16 = sphi %s2643_s16, %s3186_s16   ;;  %s2570_s15 = sphi %s2641_s15, %s3185_s15  }
   0x9   : > { %3167 = sst [smem:[#allocation13_spill]] %s2598_s22  ;;  %s2076_s26 = sadd.s32 4294967294, %s2606_s24  }
   0xa   : > { %3168 = sst [smem:[#allocation14_spill]] %s2602_s23  ;;  %s27_s27 = sadd.s32 1, %s2598_s22 }
   0xb   : > { %s30_s28 = sadd.s32 1, %s2602_s23  ;;  %p28_p0 = scmp.ge.s32.totalorder %s27_s27, 2 }
   0xc   : > { %s39_s29 = sadd.s32 1, %s2586_s19  ;;  %p46_p1 = scmp.ne.s32.totalorder %s2586_s19, %s2582_s18 }
   0xd   : > { %p47_p2 = scmp.eq.s32.totalorder %s2606_s24, 0  ;;  %s3190_s27 = smov (%p28_p0, %s27_s27), 0 }
   0xe   : > { %3169 = sst [smem:[#allocation15_spill]] %s3190_s27  ;;  %s3192_s28 = smov (!%p28_p0, %s30_s28), %s2602_s23 }
   0xf   : > { %s35_s30 = ssub.s32 %s2598_s22, %s3190_s27  ;;  %p2704_p3 = por %p47_p2, %p46_p1 }
  0x10   : > { %p32_p4 = scmp.ge.s32.totalorder %s3192_s28, 2  ;;  %s147_s6 = sadd.s32 1, %s2578_s17 }
  0x11   : > { %p157_p5 = scmp.ne.s32.totalorder %s2578_s17, %s2574_s16  ;;  %p158_p6 = scmp.eq.s32.totalorder %s2075_s25, 3 }
  0x12   : > { %s3194_s28 = smov (%p32_p4, %s3192_s28), 0  ;;  %p163_p8 = scmp.ne.s32.totalorder %s2574_s16, %s2570_s15 }
  0x13   : > { %3171 = sst [smem:[#allocation16_spill]] %s3194_s28  ;;  %p2713_p7 = por %p158_p6, %p157_p5 }
  0x14   : > { %s34_s8 = ssub.s32 %s2602_s23, %s3194_s28  ;;  %p164_p9 = scmp.eq.s32.totalorder %s2076_s26, 3 }
  0x15   : > { %s36_s9 = sor.u32 %s35_s30, %s34_s8  ;;  %p145_p10 = scmp.eq.s32.totalorder %s34_s8, 0 }
  0x16   : > { %p37_p11 = scmp.eq.s32.totalorder %s36_s9, 0  ;;  %p2721_p12 = por %p164_p9, %p163_p8 }
  0x17   : > { %s2726_s11 = scalar_select %p145_p10, %s2578_s17, %s147_s6  }
  0x18   : > { %s2729_s12 = scalar_select %p37_p11, %s2586_s19, %s39_s29  }
  0x19   : > { %3174 = sst [smem:[#allocation17_spill]] %s2726_s11  ;;  %p2078_p13 = scmp.ge.s32.totalorder %s2606_s24, 4 }
  0x1a   : > { %3175 = sst [smem:[#allocation18_spill]] %s2729_s12 }
  0x1b   : > { %180 = sbr.rel (%p2078_p13) target bundleno = 44 (0x2c), region = 16 }
  0x20   : > { %183 = sbr.rel (!%p2704_p3) target bundleno = 44 (0x2c), region = 20  ;;  %s185_s13 = sand.u32 (%p2704_p3), 1, %s2586_s19  }
  0x21   : > { %s2080_s14 = sshll.u32 (%p2704_p3), %s2602_s23, 3  ;;  %s2079_s25 = sshll.u32 (%p2704_p3), %s185_s13, 5 }
  0x22   : > { %s189_s26 = sadd.s32 (%p2704_p3), %s2598_s22, %s2080_s14  ;;  %s3176_s0 = sld [smem:[#allocation19_spill]] (%p2704_p3) }
  0x23   : > { %s2081_s30 = sshll.u32 (%p2704_p3), %s189_s26, 3  ;;  %s187_s29 = scalar_lea.vmem (%p2704_p3), [#allocation8], %s2079_s25 }
  0x28   : > { %s191_s6 = scalar_lea.vmem %s3176_s0, %s2081_s30 }
  0x29   : > { %v226_v0 = vld [vmem:[%s191_s6] sm:$0xff]  ;;  %v228_v1 = vld [vmem:[%s191_s6 + $0x10] sm:$0xff] }
  0x2a   : > { %v230_v2 = vld [vmem:[%s191_s6 + $0x20] sm:$0xff]  ;;  %227 = vst [vmem:[%s187_s29] sm:$0xff] %v226_v0  ;;  %229 = vst [vmem:[%s187_s29 + $0x8] sm:$0xff] %v228_v1  ;;  %v232_v3 = vld [vmem:[%s191_s6 + $0x30] sm:$0xff] }
  0x2b   : > { %231 = vst [vmem:[%s187_s29 + $0x10] sm:$0xff] %v230_v2  ;;  %233 = vst [vmem:[%s187_s29 + $0x18] sm:$0xff] %v232_v3 }
  0x2c PF: > { %p2082_p0 = scmp.ge.s32.totalorder %s2606_s24, 1  ;;  %p260_p1 = scmp.lt.s32.totalorder %s2606_s24, 5 }
  0x2e   : > { %p261_p2 = pnand %p2082_p0, %p260_p1 }
  0x2f   : > { %s267_s5 = sand.u32 (!%p261_p2), 1, %s2582_s18   ;;  %s3162_s13 = sand.u32 (!%p261_p2), 1, %s2574_s16  }
  0x30   : > { %264 = sbr.rel (%p261_p2) target bundleno = 910 (0x38e), region = 66  ;;  %s2083_s14 = sshll.u32 (!%p261_p2), %s267_s5, 5 }
  0x31   : > { %s2746_s25 = sshll.u32 (!%p261_p2), %s3162_s13, 2  ;;  %p312_p3 = scmp.lt.s32.totalorder (!%p261_p2), %s2594_s21, 1 }
  0x32   : > { %p314_p4 = scmp.lt.s32.totalorder (!%p261_p2), %s2590_s20, 1  ;;  %s2765_s19 = scalar_lea.vmem (!%p261_p2), [#allocation8], %s2083_s14 }
  0x33   : > { %s311_s11 = scalar_lea.vmem (!%p261_p2), [#allocation9], %s2746_s25  ;;  %p2090_p5 = scmp.ne.s32.totalorder (!%p261_p2), %s2590_s20, 0 }
  0x35   : > { %s313_s26 = scalar_select %p312_p3, %s2594_s21, 1 }
  0x36   : > { %s315_s30 = scalar_select %p314_p4, %s2590_s20, 1 }
  0x37   : > { %s2085_s8 = sshll.u32 %s313_s26, 1  ;;  %s2089_s9 = sshll.u32 %s313_s26, 2 }
  0x38   : > { %s317_s6 = sadd.s32 %s2085_s8, %s315_s30  ;;  %s2755_s28 = scalar_lea.vmem %s3157_s3, %s2089_s9 }
  0x39   : > { %s2086_s27 = sshll.u32 %s317_s6, 2  ;;  %335 = sbr.rel (%p2090_p5) target bundleno = 67 (0x43), region = 74 }
  0x3a   : > { %s319_s5 = scalar_lea.vmem %s3155_s1, %s2086_s27  ;;  %s2763_s12 = scalar_lea.vmem %s3156_s2, %s2086_s27 }
  0x3e   : > { %vm336_vm0 = vcmask 256000   ;;  %vm338_vm1 = vcmask 2048   ;;  %v2608_v4 = vmov 0.0   ;;  %v2609_v5 = vmov -inf  }
  0x3f   : > { %337 = vst.msk [vmem:[#allocation2] sm:$0x7] %vm336_vm0, %v2608_v4  ;;  %341 = vst.msk [vmem:[#allocation5] sm:$0x7] %vm336_vm0, %v2608_v4  ;;  %vm342_vm2 = vcmask 257024   ;;  %vm344_vm3 = vcmask 3072  }
  0x40   : > { %339 = vst.msk [vmem:[#allocation3] sm:$0x7] %vm338_vm1, %v2608_v4  ;;  %340 = vst.msk [vmem:[#allocation4] sm:$0x7] %vm338_vm1, %v2609_v5 }
  0x41   : > { %343 = vst.msk [vmem:[#allocation6] sm:$0xf] %vm342_vm2, %v2608_v4 }
  0x42   : > { %345 = vst.msk [vmem:[#allocation7] sm:$0xf] %vm344_vm3, %v2608_v4 }
  0x43 PF: > { %v2769_v6 = vld [vmem:[%s319_s5] sm:$0x7]  ;;  %vm1337_vm4 = vcmask 1042432   ;;  %v2610_v8 = vmov 0   ;;  %v1355_v9 = vlaneseq  ;;  %vm1342_vm5 = vcmask 2048   ;;  %v349_v20 = vld [vmem:[%s2765_s19 + $0x18] sm:$0xff] }
  0x44   : > { %v1352_v7 = vsel %vm1337_vm4, %v2769_v6, -inf  ;;  %2490 = vset.pattern.permute.xlu1 %v2610_v8  ;;  %2491 = vset.pattern.permute.xlu0 %v2610_v8  ;;  %v2611_v19 = vmov 0.0   ;;  %v2796_v21 = vand.u32 4294901760, %v349_v20  ;;  %v348_v22 = vld [vmem:[%s2765_s19 + $0x10] sm:$0xff]  ;;  %vm352_vm7 = vcmp.gt.f32.partialorder %v2769_v6, 0.5  ;;  %v347_v29 = vld [vmem:[%s2765_s19 + $0x8] sm:$0xff] }
  0x45   : > { %1353 = vmax.xlane.f32.xlu0 %v1352_v7  ;;  %v2775_v11 = vand.u32 127, %v1355_v9  ;;  %2198 = vmatprep.subr.mxu0 %v2611_v19  ;;  %v2807_v25 = vand.u32 4294901760, %v348_v22  ;;  %v2824_v31 = vand.u32 4294901760, %v347_v29  ;;  %v2829_v32 = vsel %vm352_vm7, 1.0, %v2611_v19  ;;  %v346_v36 = vld [vmem:[%s2765_s19] sm:$0xff]  ;;  %p2103_p6 = scmp.ne.s32.totalorder %s2590_s20, 1 }
  0x46   : > { %2209 = vmatprep.subr.mxu1 %v2611_v19  ;;  %2199 = vmatpush3.xpose.msra.mxu0 %v2796_v21  ;;  %v2801_v23 = vsub.f32 %v349_v20, %v2796_v21  ;;  %v429_v33 = vsub.f32 %v2829_v32, %v2829_v32  ;;  %v2847_v39 = vand.u32 4294901760, %v346_v36  ;;  %vm2612_vm8 = vmmov 0   ;;  %v2909_v50 = vld [vmem:[%s2763_s12] sm:$0xf] }
  0x47   : > { %v1872_v10 = vld [vmem:[#allocation4] sm:$0x7]  ;;  %2200 = vmatprep.subr.mxu0 %v2611_v19  ;;  %v2817_v28 = vsub.f32 %v348_v22, %v2807_v25  ;;  %v2838_v35 = vsub.f32 %v347_v29, %v2824_v31  ;;  %2206 = vmatprep.mubr.msk.f32.mxu0 %vm2612_vm8, %v2611_v19  ;;  %v2613_v49 = vmov 1.0   ;;  %vm355_vm9 = vcmp.gt.f32.partialorder %v2909_v50, 0.5  ;;  %v1336_v29 = vld [vmem:[#allocation3] sm:$0x7] }
  0x48   : > { %v2783_v15 = vld [vmem:[#allocation4] sm:$0x7]  ;;  %v2805_v24 = vand.u32 4294901760, %v2801_v23  ;;  %v2854_v41 = vsub.f32 %v346_v36, %v2847_v39  ;;  %v430_v42 = vand.u32 4294901760, %v429_v33  ;;  %2217 = vmatprep.mubr.msk.f32.mxu1 %vm2612_vm8, %v2611_v19  ;;  %v2920_v51 = vsel %vm355_vm9, 1.0, %v2611_v19 }
  0x49   : > { %v2822_v30 = vand.u32 4294901760, %v2817_v28  ;;  %v2845_v38 = vand.u32 4294901760, %v2838_v35  ;;  %v918_v52 = vsub.f32 %v2920_v51, %v2920_v51  ;;  %v1338_v60 = vsel %vm1337_vm4, %v2829_v32, 0.0 }
  0x4a   : > { %v466_v26 = vsub.f32 %v2801_v23, %v2805_v24  ;;  %2201 = vmatpush3.xpose.msra.mxu0 %v2807_v25  ;;  %v2862_v44 = vand.u32 4294901760, %v2854_v41  ;;  %v431_v45 = vsub.f32 %v429_v33, %v430_v42  ;;  %vm1345_vm12 = vcmask 1043456  }
  0x4b   : > { %2202 = vmatprep.subr.mxu0 %v2611_v19  ;;  %v473_v34 = vsub.f32 %v2817_v28, %v2822_v30  ;;  %v480_v40 = vsub.f32 %v2838_v35, %v2845_v38  ;;  %v919_v53 = vand.u32 4294901760, %v918_v52  ;;  %v1346_v62 = vsel %vm1345_vm12, %v2920_v51, 0.0 }
  0x4c   : > { %v2814_v27 = vand.u32 4294901760, %v466_v26  ;;  %v487_v46 = vsub.f32 %v2854_v41, %v2862_v44  ;;  %v432_v47 = vand.u32 4294901760, %v431_v45  ;;  %vm845_vm13 = vcmask 256000  }
  0x4d   : > { %v2842_v37 = vand.u32 4294901760, %v473_v34  ;;  %v2859_v43 = vand.u32 4294901760, %v480_v40  ;;  %v920_v54 = vsub.f32 %v918_v52, %v919_v53  ;;  %vm1334_vm15 = vcmask 257024  }
  0x4e   : > { %2210 = vmatpush3.xpose.msra.mxu1 %v2814_v27  ;;  %2203 = vmatpush3.xpose.msra.mxu0 %v2824_v31  ;;  %v2871_v48 = vand.u32 4294901760, %v487_v46  ;;  %vm1350_vm0 = vcmask 3072  }
  0x4f   : > { %2211 = vmatprep.subr.mxu1 %v2611_v19  ;;  %2204 = vmatprep.subr.mxu0 %v2611_v19  ;;  %v921_v55 = vand.u32 4294901760, %v920_v54 }
  0x52   : > { %2212 = vmatpush3.xpose.msra.mxu1 %v2842_v37  ;;  %2205 = vmatpush3.xpose.msra.mxu0 %v2847_v39 }
  0x53   : > { %2213 = vmatprep.subr.mxu1 %v2611_v19  ;;  %2220 = vmatprep.subr.mxu0 %v2611_v19 }
  0x55   : > { %2207 = vmatmul.mubr.f32.vlgmr.msra.gmra.mxu0 %v432_v47 }
  0x56   : > { %2214 = vmatpush3.xpose.msra.mxu1 %v2859_v43  ;;  %2221 = vmatpush3.xpose.msra.mxu0 %v2801_v23 }
  0x57   : > { %2215 = vmatprep.subr.mxu1 %v2611_v19  ;;  %2228 = vmatprep.mubr.msk.f32.mxu0 %vm2612_vm8, %v2611_v19 }
  0x58   : > { %2222 = vmatprep.subr.mxu0 %v2611_v19 }
  0x5a   : > { %2216 = vmatpush3.xpose.msra.mxu1 %v2871_v48  ;;  %2223 = vmatpush3.xpose.msra.mxu0 %v2817_v28 }
  0x5b   : > { %2231 = vmatprep.subr.mxu1 %v2611_v19  ;;  %2224 = vmatprep.subr.mxu0 %v2611_v19 }
  0x5d   : > { %2218 = vmatmul.mubr.msk.f32.vlgmr.msra.gmra.mxu1 %vm352_vm7, %v2613_v49 }
  0x5e   : > { %2232 = vmatpush3.xpose.msra.mxu1 %v2796_v21  ;;  %2239 = vmatprep.mubr.msk.f32.mxu1 %vm2612_vm8, %v2611_v19 }
  0x5f   : > { %2233 = vmatprep.subr.mxu1 %v2611_v19  ;;  %2225 = vmatpush3.xpose.msra.mxu0 %v2838_v35 }
  0x60   : > { %2226 = vmatprep.subr.mxu0 %v2611_v19 }
  0x62   : > { %2234 = vmatpush3.xpose.msra.mxu1 %v2807_v25 }
  0x63   : > { %2235 = vmatprep.subr.mxu1 %v2611_v19  ;;  %2227 = vmatpush3.xpose.msra.mxu0 %v2854_v41 }
  0x64   : > { %2242 = vmatprep.subr.mxu0 %v2611_v19 }
  0x66   : > { %2236 = vmatpush3.xpose.msra.mxu1 %v2824_v31  ;;  %2229 = vmatmul.mubr.f32.vlgmr.msra.gmra.mxu0 %v429_v33 }
  0x67   : > { %2237 = vmatprep.subr.mxu1 %v2611_v19  ;;  %2243 = vmatpush3.xpose.msra.mxu0 %v2805_v24 }
  0x68   : > { %2250 = vmatprep.mubr.msk.f32.mxu0 %vm2612_vm8, %v2611_v19  ;;  %2244 = vmatprep.subr.mxu0 %v2611_v19 }
  0x6a   : > { %2238 = vmatpush3.xpose.msra.mxu1 %v2847_v39 }
  0x6b   : > { %2253 = vmatprep.subr.mxu1 %v2611_v19  ;;  %2245 = vmatpush3.xpose.msra.mxu0 %v2822_v30 }
  0x6c   : > { %2246 = vmatprep.subr.mxu0 %v2611_v19 }
  0x6d   : > { %2240 = vmatmul.mubr.f32.vlgmr.msra.gmra.mxu1 %v430_v42 }
  0x6e   : > { %2254 = vmatpush3.xpose.msra.mxu1 %v2796_v21  ;;  %2261 = vmatprep.mubr.msk.f32.mxu1 %vm2612_vm8, %v2611_v19 }
  0x6f   : > { %2255 = vmatprep.subr.mxu1 %v2611_v19  ;;  %2247 = vmatpush3.xpose.msra.mxu0 %v2845_v38 }
  0x70   : > { %2248 = vmatprep.subr.mxu0 %v2611_v19 }
  0x72   : > { %2256 = vmatpush3.xpose.msra.mxu1 %v2807_v25 }
  0x73   : > { %2257 = vmatprep.subr.mxu1 %v2611_v19  ;;  %2249 = vmatpush3.xpose.msra.mxu0 %v2862_v44 }
  0x74   : > { %2264 = vmatprep.subr.mxu0 %v2611_v19 }
  0x76   : > { %2258 = vmatpush3.xpose.msra.mxu1 %v2824_v31  ;;  %2251 = vmatmul.mubr.msk.f32.vlgmr.msra.gmra.mxu0 %vm352_vm7, %v2613_v49 }
  0x77   : > { %2259 = vmatprep.subr.mxu1 %v2611_v19  ;;  %2265 = vmatpush3.xpose.msra.mxu0 %v2796_v21 }
  0x78   : > { %2272 = vmatprep.mubr.msk.f32.mxu0 %vm2612_vm8, %v2611_v19  ;;  %2266 = vmatprep.subr.mxu0 %v2611_v19 }
  0x7a   : > { %2260 = vmatpush3.xpose.msra.mxu1 %v2847_v39 }
  0x7b   : > { %2275 = vmatprep.subr.mxu1 %v2611_v19  ;;  %2267 = vmatpush3.xpose.msra.mxu0 %v2807_v25 }
  0x7c   : > { %2268 = vmatprep.subr.mxu0 %v2611_v19 }
  0x7d   : > { %2262 = vmatmul.mubr.msk.f32.vlgmr.msra.gmra.mxu1 %vm352_vm7, %v2613_v49 }
  0x7e   : > { %2276 = vmatpush3.xpose.msra.mxu1 %v2814_v27  ;;  %2283 = vmatprep.mubr.msk.f32.mxu1 %vm2612_vm8, %v2611_v19 }
  0x7f   : > { %2277 = vmatprep.subr.mxu1 %v2611_v19  ;;  %2269 = vmatpush3.xpose.msra.mxu0 %v2824_v31 }
  0x80   : > { %2270 = vmatprep.subr.mxu0 %v2611_v19 }
  0x82   : > { %2278 = vmatpush3.xpose.msra.mxu1 %v2842_v37 }
  0x83   : > { %2279 = vmatprep.subr.mxu1 %v2611_v19  ;;  %2271 = vmatpush3.xpose.msra.mxu0 %v2847_v39 }
  0x84   : > { %2286 = vmatprep.subr.mxu0 %v2611_v19 }
  0x86   : > { %2280 = vmatpush3.xpose.msra.mxu1 %v2859_v43  ;;  %2273 = vmatmul.mubr.f32.vlgmr.msra.gmra.mxu0 %v921_v55 }
  0x87   : > { %2281 = vmatprep.subr.mxu1 %v2611_v19  ;;  %2287 = vmatpush3.xpose.msra.mxu0 %v2801_v23 }
  0x88   : > { %2294 = vmatprep.mubr.msk.f32.mxu0 %vm2612_vm8, %v2611_v19  ;;  %2288 = vmatprep.subr.mxu0 %v2611_v19 }
  0x8a   : > { %2282 = vmatpush3.xpose.msra.mxu1 %v2871_v48 }
  0x8b   : > { %2297 = vmatprep.subr.mxu1 %v2611_v19  ;;  %2289 = vmatpush3.xpose.msra.mxu0 %v2817_v28 }
  0x8c   : > { %2290 = vmatprep.subr.mxu0 %v2611_v19 }
  0x8d   : > { %2284 = vmatmul.mubr.msk.f32.vlgmr.msra.gmra.mxu1 %vm355_vm9, %v2613_v49 }
  0x8e   : > { %2298 = vmatpush3.xpose.msra.mxu1 %v2796_v21  ;;  %2305 = vmatprep.mubr.msk.f32.mxu1 %vm2612_vm8, %v2611_v19 }
  0x8f   : > { %2299 = vmatprep.subr.mxu1 %v2611_v19  ;;  %2291 = vmatpush3.xpose.msra.mxu0 %v2838_v35 }
  0x90   : > { %2292 = vmatprep.subr.mxu0 %v2611_v19 }
  0x92   : > { %2300 = vmatpush3.xpose.msra.mxu1 %v2807_v25 }
  0x93   : > { %2301 = vmatprep.subr.mxu1 %v2611_v19  ;;  %2293 = vmatpush3.xpose.msra.mxu0 %v2854_v41 }
  0x94   : > { %2308 = vmatprep.subr.mxu0 %v2611_v19 }
  0x96   : > { %2302 = vmatpush3.xpose.msra.mxu1 %v2824_v31  ;;  %2295 = vmatmul.mubr.f32.vlgmr.msra.gmra.mxu0 %v918_v52 }
  0x97   : > { %2303 = vmatprep.subr.mxu1 %v2611_v19  ;;  %2309 = vmatpush3.xpose.msra.mxu0 %v2805_v24 }
  0x98   : > { %2316 = vmatprep.mubr.msk.f32.mxu0 %vm2612_vm8, %v2611_v19  ;;  %2310 = vmatprep.subr.mxu0 %v2611_v19 }
  0x9a   : > { %2304 = vmatpush3.xpose.msra.mxu1 %v2847_v39 }
  0x9b   : > { %2319 = vmatprep.subr.mxu1 %v2611_v19  ;;  %2311 = vmatpush3.xpose.msra.mxu0 %v2822_v30 }
  0x9c   : > { %2312 = vmatprep.subr.mxu0 %v2611_v19 }
  0x9d   : > { %2306 = vmatmul.mubr.f32.vlgmr.msra.gmra.mxu1 %v919_v53 }
  0x9e   : > { %2320 = vmatpush3.xpose.msra.mxu1 %v2796_v21  ;;  %2327 = vmatprep.mubr.msk.f32.mxu1 %vm2612_vm8, %v2611_v19 }
  0x9f   : > { %2321 = vmatprep.subr.mxu1 %v2611_v19  ;;  %2313 = vmatpush3.xpose.msra.mxu0 %v2845_v38 }
  0xa0   : > { %2314 = vmatprep.subr.mxu0 %v2611_v19 }
  0xa2   : > { %2322 = vmatpush3.xpose.msra.mxu1 %v2807_v25 }
  0xa3   : > { %2323 = vmatprep.subr.mxu1 %v2611_v19  ;;  %2315 = vmatpush3.xpose.msra.mxu0 %v2862_v44 }
  0xa4   : > { %2330 = vmatprep.subr.mxu0 %v2611_v19 }
  0xa6   : > { %2324 = vmatpush3.xpose.msra.mxu1 %v2824_v31  ;;  %2317 = vmatmul.mubr.msk.f32.vlgmr.msra.gmra.mxu0 %vm355_vm9, %v2613_v49 }
  0xa7   : > { %2325 = vmatprep.subr.mxu1 %v2611_v19  ;;  %2331 = vmatpush3.xpose.msra.mxu0 %v2796_v21 }
  0xa8   : > { %2338 = vmatprep.mubr.msk.f32.mxu0 %vm2612_vm8, %v2611_v19  ;;  %2332 = vmatprep.subr.mxu0 %v2611_v19 }
  0xaa   : > { %2326 = vmatpush3.xpose.msra.mxu1 %v2847_v39 }
  0xab   : > { %2341 = vmatprep.subr.mxu1 %v2611_v19  ;;  %2333 = vmatpush3.xpose.msra.mxu0 %v2807_v25 }
  0xac   : > { %2334 = vmatprep.subr.mxu0 %v2611_v19 }
  0xad   : > { %2328 = vmatmul.mubr.msk.f32.vlgmr.msra.gmra.mxu1 %vm355_vm9, %v2613_v49 }
  0xae   : > { %2342 = vmatpush3.xpose.msra.mxu1 %v2814_v27  ;;  %2349 = vmatprep.mubr.msk.f32.mxu1 %vm2612_vm8, %v2611_v19 }
  0xaf   : > { %2343 = vmatprep.subr.mxu1 %v2611_v19  ;;  %2335 = vmatpush3.xpose.msra.mxu0 %v2824_v31 }
  0xb0   : > { %2336 = vmatprep.subr.mxu0 %v2611_v19 }
  0xb2   : > { %2344 = vmatpush3.xpose.msra.mxu1 %v2842_v37 }
  0xb3   : > { %2345 = vmatprep.subr.mxu1 %v2611_v19  ;;  %2337 = vmatpush3.xpose.msra.mxu0 %v2847_v39 }
  0xb4   : > { %2352 = vmatprep.subr.mxu0 %v2611_v19 }
  0xb6   : > { %2346 = vmatpush3.xpose.msra.mxu1 %v2859_v43 }
  0xb7   : > { %2347 = vmatprep.subr.mxu1 %v2611_v19 }
  0xba   : > { %2348 = vmatpush3.xpose.msra.mxu1 %v2871_v48 }
  0xbb   : > { %2363 = vmatprep.subr.mxu1 %v2611_v19 }
  0xce   : > { %v2777_v12 = vpop.xlane.xlu0 %1353 }
  0xcf   : > { %vm1357_vm6 = vcmp.eq.f32.partialorder %v2769_v6, %v2777_v12  ;;  %v1873_v13 = vmax.f32 %v1872_v10, %v2777_v12  ;;  %vm1863_vm11 = vcmp.gt.f32.partialorder %v2777_v12, %v2783_v15 }
  0xd0   : > { %v1358_v14 = vsel %vm1357_vm6, %v2775_v11, 128  ;;  %v1865_v61 = vsel %vm1863_vm11, 1, %v2610_v8  ;;  %v358_v8 = vld [vmem:[#allocation2] sm:$0x7] }
  0xd1   : > { %v2786_v16 = vsel %vm1337_vm4, %v1358_v14, 2147483647  ;;  %1874 = vst.msk [vmem:[#allocation4] sm:$0x7] %vm1342_vm5, %v1873_v13 }
  0xd2   : > { %v1361_v17 = vshra.s32 %v2786_v16, 16  ;;  %v1360_v56 = vand.u32 65535, %v2786_v16 }
  0xd4   : > { %v2790_v18 = vcvt.s32.f32 %v1361_v17  ;;  %v1362_v58 = vcvt.s32.f32 %v1360_v56 }
  0xd6   : > { %1364 = vmin.xlane.f32.xlu0 %v2790_v18 }
  0xda   : > { %1347 = vadd.xlane.f32.xlu0 %v1346_v62 }
 0x115   : > { %v434_v63 = vpop.f32.mrf.mxu0 }
 0x117   : > { %v2208_v0 = vpop.f32.mrf.mxu0 }
 0x11d   : > { %v525_v1 = vpop.f32.mrf.mxu1 }
 0x11e   : > { %v526_v6 = vadd.f32 %v525_v1, %v434_v63 }
 0x11f   : > { %v2219_v2 = vpop.f32.mrf.mxu1 }
 0x126   : > { %v605_v3 = vpop.f32.mrf.mxu0 }
 0x127   : > { %v606_v9 = vadd.f32 %v605_v3, %v526_v6 }
 0x128   : > { %v2230_v4 = vpop.f32.mrf.mxu0 }
 0x12d   : > { %v682_v5 = vpop.f32.mrf.mxu1 }
 0x12e   : > { %v683_v10 = vadd.f32 %v682_v5, %v606_v9  ;;  %v1864_v5 = vld [vmem:[#allocation5] sm:$0x7] }
 0x12f   : > { %v2241_v7 = vpop.f32.mrf.mxu1 }
 0x136   : > { %v765_v13 = vpop.f32.mrf.mxu0 }
 0x137   : > { %v766_v12 = vadd.f32 %v765_v13, %v683_v10 }
 0x138   : > { %v2252_v14 = vpop.f32.mrf.mxu0 }
 0x13d   : > { %v840_v15 = vpop.f32.mrf.mxu1 }
 0x13e   : > { %v841_v16 = vadd.f32 %v840_v15, %v766_v12 }
 0x13f   : > { %v2263_v17 = vpop.f32.mrf.mxu1 }
 0x146   : > { %v923_v32 = vpop.f32.mrf.mxu0 }
 0x148   : > { %v2274_v36 = vpop.f32.mrf.mxu0 }
 0x14d   : > { %v1014_v43 = vpop.f32.mrf.mxu1 }
 0x14e   : > { %v1015_v52 = vadd.f32 %v1014_v43, %v923_v32 }
 0x14f   : > { %v2285_v46 = vpop.f32.mrf.mxu1 }
 0x156   : > { %v1094_v50 = vpop.f32.mrf.mxu0 }
 0x157   : > { %v1095_v53 = vadd.f32 %v1094_v50, %v1015_v52 }
 0x158   : > { %v2296_v51 = vpop.f32.mrf.mxu0 }
 0x15f   : > { %v1365_v57 = vpop.xlane.xlu0 %1364 }
 0x160   : > { %vm1366_vm10 = vcmp.eq.f32.partialorder %v2790_v18, %v1365_v57  ;;  %v844_v18 = vadd.f32 %v841_v16, %v358_v8  ;;  %v1371_v20 = vcvt.f32.s32 %v1365_v57 }
 0x161   : > { %v1367_v59 = vsel %vm1366_vm10, %v1362_v58, inf }
 0x162   : > { %1368 = vmin.xlane.f32.xlu1 %v1367_v59  ;;  %846 = vst.msk [vmem:[#allocation2] sm:$0x7] %vm845_vm13, %v844_v18  ;;  %v1372_v26 = vshll.u32 %v1371_v20, 16 }
 0x163   : > { %v1348_v56 = vpop.xlane.xlu0 %1347 }
 0x166   : > { %1339 = vadd.xlane.f32.xlu1 %v1338_v60 }
 0x177   : > { %1867 = vperm.xlu1 %2490, %v1865_v61  }
 0x1eb   : > { %v1369_v22 = vpop.xlane.xlu1 %1368 }
 0x1ec   : > { %v1370_v27 = vcvt.f32.s32 %v1369_v22 }
 0x1ee   : > { %v3033_v33 = vadd.s32 %v1372_v26, %v1370_v27 }
 0x1ef   : > { %v1340_v34 = vpop.xlane.xlu1 %1339 }
 0x1f0   : > { %vm1374_vm14 = vcmp.eq.s32.totalorder %v2775_v11, %v3033_v33  ;;  %v1341_v37 = vadd.f32 %v1340_v34, %v1336_v29 }
 0x1f1   : > { %v2099_v40 = vsel %vm1374_vm14, 1.0, %v2611_v19  ;;  %2350 = vmatmul.mubr.msk.f32.vlgmr.msra.gmra.mxu1 %vm1374_vm14, %v2613_v49 }
 0x1f2   : > { %v1447_v42 = vsub.f32 %v2099_v40, %v2099_v40  ;;  %1343 = vst.msk [vmem:[#allocation3] sm:$0x7] %vm1342_vm5, %v1341_v37  ;;  %2364 = vmatpush3.xpose.msra.mxu1 %v2796_v21  ;;  %2371 = vmatprep.mubr.msk.f32.mxu1 %vm2612_vm8, %v2611_v19 }
 0x1f3   : > { %2365 = vmatprep.subr.mxu1 %v2611_v19 }
 0x1f4   : > { %v1448_v45 = vand.u32 4294901760, %v1447_v42 }
 0x1f6   : > { %2366 = vmatpush3.xpose.msra.mxu1 %v2807_v25  ;;  %v1449_v47 = vsub.f32 %v1447_v42, %v1448_v45 }
 0x1f7   : > { %2367 = vmatprep.subr.mxu1 %v2611_v19 }
 0x1f8   : > { %v1450_v48 = vand.u32 4294901760, %v1449_v47 }
 0x1fa   : > { %2368 = vmatpush3.xpose.msra.mxu1 %v2824_v31  ;;  %2339 = vmatmul.mubr.f32.vlgmr.msra.gmra.mxu0 %v1450_v48 }
 0x1fb   : > { %2353 = vmatpush3.xpose.msra.mxu0 %v2801_v23  ;;  %2369 = vmatprep.subr.mxu1 %v2611_v19  ;;  %v1171_v23 = vpop.f32.mrf.mxu1 }
 0x1fc   : > { %2354 = vmatprep.subr.mxu0 %v2611_v19  ;;  %2360 = vmatprep.mubr.msk.f32.mxu0 %vm2612_vm8, %v2611_v19 }
 0x1fe   : > { %2370 = vmatpush3.xpose.msra.mxu1 %v2847_v39 }
 0x1ff   : > { %2355 = vmatpush3.xpose.msra.mxu0 %v2817_v28  ;;  %2385 = vmatprep.subr.mxu1 %v2611_v19  ;;  %v2307_v28 = vpop.f32.mrf.mxu1 }
 0x200   : > { %2356 = vmatprep.subr.mxu0 %v2611_v19 }
 0x201   : > { %2372 = vmatmul.mubr.f32.vlgmr.msra.gmra.mxu1 %v1448_v45 }
 0x202   : > { %2386 = vmatpush3.xpose.msra.mxu1 %v2796_v21  ;;  %2393 = vmatprep.mubr.msk.f32.mxu1 %vm2612_vm8, %v2611_v19  ;;  %v1172_v21 = vadd.f32 %v1171_v23, %v1095_v53 }
 0x203   : > { %2357 = vmatpush3.xpose.msra.mxu0 %v2838_v35  ;;  %2387 = vmatprep.subr.mxu1 %v2611_v19 }
 0x204   : > { %2358 = vmatprep.subr.mxu0 %v2611_v19 }
 0x206   : > { %2388 = vmatpush3.xpose.msra.mxu1 %v2807_v25  ;;  %v1254_v25 = vpop.f32.mrf.mxu0 }
 0x207   : > { %2359 = vmatpush3.xpose.msra.mxu0 %v2854_v41  ;;  %2389 = vmatprep.subr.mxu1 %v2611_v19  ;;  %v1255_v35 = vadd.f32 %v1254_v25, %v1172_v21 }
 0x208   : > { %2374 = vmatprep.subr.mxu0 %v2611_v19  ;;  %v2318_v41 = vpop.f32.mrf.mxu0 }
 0x20a   : > { %2361 = vmatmul.mubr.f32.vlgmr.msra.gmra.mxu0 %v1447_v42  ;;  %2390 = vmatpush3.xpose.msra.mxu1 %v2824_v31  ;;  %v1329_v31 = vpop.f32.mrf.mxu1 }
 0x20b   : > { %2375 = vmatpush3.xpose.msra.mxu0 %v2805_v24  ;;  %2391 = vmatprep.subr.mxu1 %v2611_v19  ;;  %v847_v24 = vld [vmem:[#allocation6] sm:$0xf]  ;;  %v1330_v54 = vadd.f32 %v1329_v31, %v1255_v35 }
 0x20c   : > { %2376 = vmatprep.subr.mxu0 %v2611_v19  ;;  %2382 = vmatprep.mubr.msk.f32.mxu0 %vm2612_vm8, %v2611_v19 }
 0x20d   : > { %v1333_v55 = vadd.f32 %v1330_v54, %v847_v24 }
 0x20e   : > { %2392 = vmatpush3.xpose.msra.mxu1 %v2847_v39  ;;  %v2329_v39 = vpop.f32.mrf.mxu1 }
 0x20f   : > { %2377 = vmatpush3.xpose.msra.mxu0 %v2822_v30  ;;  %1335 = vst.msk [vmem:[#allocation6] sm:$0xf] %vm1334_vm15, %v1333_v55  ;;  %v1344_v30 = vld [vmem:[#allocation7] sm:$0xf] }
 0x210   : > { %2378 = vmatprep.subr.mxu0 %v2611_v19  ;;  %v1349_v57 = vadd.f32 %v1348_v56, %v1344_v30 }
 0x211   : > { %2394 = vmatmul.mubr.msk.f32.vlgmr.msra.gmra.mxu1 %vm1374_vm14, %v2613_v49 }
 0x212   : > { %1351 = vst.msk [vmem:[#allocation7] sm:$0xf] %vm1350_vm0, %v1349_v57 }
 0x213   : > { %2379 = vmatpush3.xpose.msra.mxu0 %v2845_v38 }
 0x214   : > { %2380 = vmatprep.subr.mxu0 %v2611_v19 }
 0x217   : > { %2381 = vmatpush3.xpose.msra.mxu0 %v2862_v44 }
 0x21a   : > { %2383 = vmatmul.mubr.msk.f32.vlgmr.msra.gmra.mxu0 %vm1374_vm14, %v2613_v49  ;;  %v1868_v49 = vpop.permute.xlu1 %1867 }
 0x21b   : > { %vm1869_vm1 = vcmp.eq.s32.totalorder %v1868_v49, 1 }
 0x2b1   : > { %v1543_v38 = vpop.f32.mrf.mxu1 }
 0x2b3   : > { %v2351_v58 = vpop.f32.mrf.mxu1 }
 0x2ba   : > { %v1452_v19 = vpop.f32.mrf.mxu0 }
 0x2bb   : > { %v1544_v0 = vadd.f32 %v1543_v38, %v1452_v19 }
 0x2bc   : > { %v2340_v59 = vpop.f32.mrf.mxu0 }
 0x2c1   : > { %v1700_v60 = vpop.f32.mrf.mxu1 }
 0x2c3   : > { %v2373_v61 = vpop.f32.mrf.mxu1 }
 0x2ca   : > { %v1623_v62 = vpop.f32.mrf.mxu0 }
 0x2cb   : > { %v1624_v2 = vadd.f32 %v1623_v62, %v1544_v0 }
 0x2cc   : > { %v2362_v44 = vpop.f32.mrf.mxu0 }
 0x2cd   : > { %v1701_v3 = vadd.f32 %v1700_v60, %v1624_v2 }
 0x2d1   : > { %v1858_v63 = vpop.f32.mrf.mxu1 }
 0x2d3   : > { %v2395_v1 = vpop.f32.mrf.mxu1 }
 0x2da   : > { %v1783_v11 = vpop.f32.mrf.mxu0 }
 0x2db   : > { %v1784_v4 = vadd.f32 %v1783_v11, %v1701_v3 }
 0x2dc   : > { %v2384_v6 = vpop.f32.mrf.mxu0  ;;  %1878 = sbr.rel (%p2103_p6) target bundleno = 886 (0x376), region = 78 }
 0x2dd   : > { %v1859_v7 = vadd.f32 %v1858_v63, %v1784_v4 }
 0x2df   : > { %v1870_v9 = vsel %vm1869_vm1, %v1859_v7, %v1864_v5 }
 0x2e0   : > { %1871 = vst.msk [vmem:[#allocation5] sm:$0x7] %vm845_vm13, %v1870_v9 }
 0x2e1   : > { %v1879_v10 = vld [vmem:[#allocation3] sm:$0x7]  ;;  %v1898_v13 = vld [vmem:[#allocation7] sm:$0xf]  ;;  %v2614_v12 = vmov 0  }
 0x2e2   : > { %2492 = vset.pattern.permute.xlu0 %v2614_v12  ;;  %v1881_v14 = vmax.f32 %v1879_v10, 1.0  ;;  %2493 = vset.pattern.permute.xlu1 %v2614_v12  ;;  %vm1889_vm2 = vcmp.gt.f32.partialorder %v1879_v10, 0.0  ;;  %vm1908_vm3 = vcmp.gt.f32.partialorder %v1898_v13, 0.0  ;;  %v1900_v15 = vmax.f32 %v1898_v13, 1.0  ;;  %v1880_v22 = vld [vmem:[#allocation2] sm:$0x7] }
 0x2e3   : > { %v1891_v8 = vsel %vm1889_vm2, 1, %v2614_v12  ;;  %v1909_v16 = vsel %vm1908_vm3, 1, %v2614_v12  ;;  %v1899_v32 = vld [vmem:[#allocation6] sm:$0xf] }
 0x2e4   : > { %1884 = vperm.xlu0 %2492, %v1881_v14   ;;  %1893 = vperm.xlu1 %2493, %v1891_v8  }
 0x2e7   : > { %v1890_v27 = vld [vmem:[#allocation5] sm:$0x7] }
 0x2e8   : > { %1903 = vperm.xlu0 %2492, %v1900_v15   ;;  %1911 = vperm.xlu1 %2493, %v1909_v16  }
 0x35f   : > { %v1885_v17 = vpop.permute.xlu0 %1884  ;;  %v1894_v20 = vpop.permute.xlu1 %1893 }
 0x360   : > { %2494 = vrcp.f32 %v1885_v17  ;;  %vm1895_vm4 = vcmp.eq.s32.totalorder %v1894_v20, 1 }
 0x363   : > { %v1904_v18 = vpop.permute.xlu0 %1903  ;;  %v1912_v34 = vpop.permute.xlu1 %1911 }
 0x364   : > { %2496 = vrcp.f32 %v1904_v18  ;;  %vm1913_vm5 = vcmp.eq.s32.totalorder %v1912_v34, 1 }
 0x36d   : > { %v2495_v26 = vpop.eup %2494 }
 0x36e   : > { %v1888_v29 = vmul.f32 %v2495_v26, %v1880_v22 }
 0x370   : > { %v1896_v33 = vsel %vm1895_vm4, %v1888_v29, %v1890_v27 }
 0x371   : > { %v2497_v36 = vpop.eup %2496  ;;  %1897 = vst.msk [vmem:[%s2755_s28] sm:$0x7] %vm845_vm13, %v1896_v33 }
 0x372   : > { %v1907_v37 = vmul.f32 %v2497_v36, %v1899_v32 }
 0x374   : > { %v1914_v40 = vsel %vm1913_vm5, %v1907_v37, 0.0 }
 0x375   : > { %1915 = vst.msk [vmem:[%s311_s11] sm:$0xf] %vm1334_vm15, %v1914_v40 }
 0x376 PF: > { %s2105_s0 = sshll.u32 %s2594_s21, 6  ;;  %s1937_s23 = sshll.u32 %s311_s11, 4  ;;  %s1938_s23 = int_to_ptr.vmem [resolvable:$true] %s1937_s23 }
 0x377   : > { %s1935_s22 = scalar_lea.hbm %s3158_s4, %s2105_s0  ;;  %s3177_s27 = sand.u32 1, %s2574_s16  }
 0x378   : > { %s1921_s28 = scalar_lea.sflag [#allocation10], %s3177_s27  ;;  %s2498_s12 = scalar_lea.vmem %s1938_s23, 64 }
 0x379   : > { %p2499_p8 = scmp.ne.s32.totalorder %s1938_s23, %s2498_s12  ;;  %s2615_s13 = smov [#allocation9]  }
 0x37a   : > { %s2502_s14 = sshll.u32 %s2615_s13, 4  ;;  %s2503_s14 = int_to_ptr.vmem [resolvable:$false] %s2502_s14 }
 0x37b   : > { %p2500_p9 = pnand %p2499_p8, %p2713_p7  ;;  %s2504_s26 = scalar_lea.vmem %s2503_s14, 128 }
 0x37c   : > { %p2505_p11 = scmp.lt.s32.totalorder %s1938_s23, %s2503_s14  ;;  %p2506_p13 = scmp.lt.s32.totalorder %s2504_s26, %s2498_s12 }
 0x37d   : > { %p2501_p10 = pneg %p2500_p9 }
 0x37e   : > { %p2507_p0 = por %p2506_p13, %p2505_p11 }
 0x380   : > { %p2508_p1 = pnand %p2507_p0, %p2501_p10 }
 0x382   : > { %2511 = shalt.err (!%p2508_p1)
}
 0x383   : > { %s2512_s21 = scalar_lea.hbm %s1935_s22, 64  ;;  %s2516_s30 = scalar_lea.hbm %s3158_s4, 128 }
 0x384   : > { %p2513_p2 = scmp.ne.s32.totalorder %s1935_s22, %s2512_s21  ;;  %p2517_p5 = scmp.lt.s32.totalorder %s1935_s22, %s3158_s4 }
 0x385   : > { %p2518_p6 = scmp.lt.s32.totalorder %s2516_s30, %s2512_s21 }
 0x386   : > { %p2514_p3 = pnand %p2513_p2, %p2713_p7 }
 0x387   : > { %p2519_p8 = por %p2518_p6, %p2517_p5 }
 0x388   : > { %p2515_p4 = pneg %p2514_p3 }
 0x38a   : > { %p2520_p9 = pnand %p2519_p8, %p2515_p4 }
 0x38c   : > { %2523 = shalt.err (!%p2520_p9)
}
 0x38d   : > { %2396 = dma.vmem_to_hbm [thread:$0]  (%p2713_p7), %s1938_s23, 64, %s1935_s22, %s1921_s28  }
 0x38e PF: > { %p2402_p10 = scmp.ge.s32.totalorder %s2606_s24, 2  ;;  %s1956_s6 = sand.u32 1, %s2570_s15  }
 0x38f   : > { %s1957_s29 = scalar_lea.sflag [#allocation10], %s1956_s6 }
 0x390   : > { %p2399_p11 = pnand %p2402_p10, %p2721_p12 }
 0x392   : > { %p2400_p13 = pneg %p2399_p11 }
 0x394   : > { %2565 = dma.done.wait (%p2400_p13), %s1957_s29, 64  }
 0x395   : > { %2567 = vsyncadd (%p2400_p13), %s1957_s29, 4294967232  ;;  %s18_s24 = sadd.s32 1, %s2606_s24   ;;  %s3178_s18 = sld [smem:[#allocation17_spill]] }
 0x396   : > { %p15_p0 = scmp.ge.s32.totalorder %s18_s24, 6   ;;  %s3179_s7 = sld [smem:[#allocation12_spill]] }
 0x397   : > { %s3180_s19 = sld [smem:[#allocation18_spill]]  ;;  %s3185_s15 = smov %s2574_s16 }
 0x398   : > { %s3181_s20 = sld [smem:[#allocation13_spill]]  ;;  %s3186_s16 = smov %s2578_s17 }
 0x399   : > { %s3182_s21 = sld [smem:[#allocation14_spill]]  ;;  %17 = sbr.rel (!%p15_p0) target bundleno = 8 (0x8), region = 136 }
 0x39a   : > { %s3183_s22 = sld [smem:[#allocation15_spill]] }
 0x39b   : > { %s3184_s23 = sld [smem:[#allocation16_spill]]  ;;  %s3187_s17 = smov %s3178_s18 }
 0x39c   : > { %s3188_s18 = smov %s3179_s7 }
 0x39e   :  { %1962 = vsyncpa [#allocation10], 1 }
 0x39f   :  { %1964 = vsyncpa [#allocation10 + $0x1], 1 }

</bundles_post_ra>
